<compile_context>
chip_gen: v6e
topology: v6e:2x2x1
jax: 0.10.0
libtpu: 0.0.40
codegen_flags: <defaults>
</compile_context>

<pallas_src>
import math

import jax
import jax.numpy as jnp
from jax.experimental import pallas as pl
from jax.experimental.pallas import tpu as pltpu


def _round_up(x: int, m: int) -> int:
    return ((x + m - 1) // m) * m


def _make_pinball_kernel(valid_rows, tile_rows, slab, needs_mask):
    """Builds the per-tile kernel; all sizes are static Python ints."""
    n_slabs = tile_rows // slab
    assert n_slabs * slab == tile_rows

    def kernel(pred_ref, target_ref, q_ref, out_ref):
        # q_ref: (1, cols) resident quantile row; broadcasts against data slabs.
        q = q_ref[...].astype(jnp.float32)
        base = pl.program_id(0) * tile_rows

        def slab_loss(p_raw, t_raw, row0):
            p = p_raw.astype(jnp.float32)
            t = t_raw.astype(jnp.float32)
            e = t - p
            # max(q*e, (q-1)*e) == q*e + max(-e, 0)   (exact for all q, e)
            loss = q * e + jnp.maximum(-e, 0.0)
            if needs_mask:
                rid = row0 + jax.lax.broadcasted_iota(jnp.int32, (slab, 1), 0)
                loss = jnp.where(rid < valid_rows, loss, 0.0)
            return jnp.sum(loss)

        if n_slabs == 1:
            total = slab_loss(pred_ref[...], target_ref[...], base)
        else:
            def body(i, acc):
                r0 = pl.multiple_of(i * slab, slab)
                return acc + slab_loss(pred_ref[pl.ds(r0, slab), :],
                                       target_ref[pl.ds(r0, slab), :],
                                       base + r0)
            total = jax.lax.fori_loop(0, n_slabs, body, jnp.float32(0.0))

        # Per-tile partial sum -> (1, 1) SMEM output block; reduced in wrapper.
        out_ref[0, 0] = total

    return kernel


def pinball_loss(pred, target, quantiles, *, block_bytes=4 << 20,
                 tile_rows=None):
    """Pinball / quantile loss.  pred, target: (B, Q); quantiles: (Q,)."""
    B, Q = pred.shape
    assert target.shape == (B, Q)
    q_flat = jnp.asarray(quantiles, jnp.float32).reshape(-1)
    assert q_flat.shape[0] == Q

    itemsize = max(jnp.dtype(pred.dtype).itemsize,
                   jnp.dtype(target.dtype).itemsize)
    min_itemsize = min(jnp.dtype(pred.dtype).itemsize,
                       jnp.dtype(target.dtype).itemsize)
    # Native sublane multiple: 8 (f32) / 16 (bf16) / 32 (int8/fp8).
    sub = max(8, 8 * (4 // max(1, min_itemsize)))

    # Lane width: multiple of 128 that Q divides -> the quantile pattern is
    # identical on every lane-dense row.
    lane = (128 * Q) // math.gcd(128, Q)          # lcm(128, Q)

    if lane <= 8192:
        total = B * Q
        rows = pl.cdiv(total, lane)               # valid rows
        cols = lane
        pad = rows * lane - total
        def _prep(x):
            flat = x.reshape(-1)                  # contiguous reshape: no copy
            if pad:                               # rare (< lane elems); zeros
                flat = jnp.pad(flat, (0, pad))    # contribute exactly 0 loss
            return flat.reshape(rows, lane)
        pred2, target2 = _prep(pred), _prep(target)
        q_row = jnp.tile(q_flat, lane // Q).reshape(1, lane)
    else:
        # Pathological Q: keep the native (B, Q) layout (Q is the full last
        # dim, Q >= 65 here so lane utilization >= ~50%).  No per-element q
        # stream, no pad, no copies.
        rows, cols = B, Q
        pred2, target2 = pred, target
        q_row = q_flat.reshape(1, Q)

    # Slab (inner-loop) rows: keep f32 temporaries <= ~2 MiB, multiple of sub.
    slab_cap = max(sub, min(256, ((2 << 20) // (cols * 4)) // sub * sub))

    if tile_rows is None:
        slab = min(slab_cap, _round_up(rows, sub))
        # ~block_bytes per input block per pipeline buffer, multiple of slab.
        budget = max(slab, (block_bytes // (cols * itemsize)) // slab * slab)
        tile_rows = min(budget, _round_up(rows, slab))
        # Let both v7x TensorCores get a tile when there is enough data.
        if rows * cols * itemsize > (512 << 10):
            tile_rows = min(tile_rows, _round_up(pl.cdiv(rows, 2), slab))
        tile_rows = max(slab, _round_up(tile_rows, slab))
    else:
        tile_rows = max(sub, _round_up(int(tile_rows), sub))
        slab = min(slab_cap, tile_rows)
        tile_rows = _round_up(tile_rows, slab)

    num_tiles = pl.cdiv(rows, tile_rows)
    needs_mask = (num_tiles * tile_rows) != rows   # ragged last tile -> mask

    data_spec = pl.BlockSpec((tile_rows, cols), lambda i: (i, 0))
    q_spec = pl.BlockSpec((1, cols), lambda i: (0, 0))   # resident, one DMA
    out_spec = pl.BlockSpec((1, 1), lambda i: (i, 0),
                            memory_space=pltpu.MemorySpace.SMEM)

    n_elems = B * Q
    cost = pl.CostEstimate(
        flops=5 * n_elems,
        transcendentals=0,
        bytes_accessed=(n_elems * (jnp.dtype(pred.dtype).itemsize
                                   + jnp.dtype(target.dtype).itemsize)
                        + cols * 4 + num_tiles * 4),
    )

    kernel = _make_pinball_kernel(rows, tile_rows, slab, needs_mask)

    partials = pl.pallas_call(
        kernel,
        out_shape=jax.ShapeDtypeStruct((num_tiles, 1), jnp.float32),
        grid=(num_tiles,),
        in_specs=[data_spec, data_spec, q_spec],
        out_specs=out_spec,
        compiler_params=pltpu.CompilerParams(
            dimension_semantics=("parallel",),
            vmem_limit_bytes=48 * 1024 * 1024),
        cost_estimate=cost,
    )(pred2, target2, q_row)

    # mean over batch of per-sample sums == total_sum / B for 2D inputs.
    return jnp.sum(partials) / jnp.float32(B)


def pinball_loss_ref(pred, target, quantiles):
    """Pure-JAX reference mirroring the PyTorch forward."""
    q = jnp.asarray(quantiles, jnp.float32)
    error = target.astype(jnp.float32) - pred.astype(jnp.float32)
    upper = q * error
    lower = (q - 1.0) * error
    losses = jnp.maximum(lower, upper)
    return jnp.mean(jnp.sum(losses, axis=1))


if __name__ == "__main__":
    key = jax.random.PRNGKey(0)
    k1, k2, k3, k4, k5, k6, k7, k8 = jax.random.split(key, 8)

    quantiles = jnp.array([0.1, 0.5, 0.9, 0.99], dtype=jnp.float32)

    # 1) Small case (single tile, in-kernel row mask for the ragged tile).
    B, Q = 8, 4
    pred = jax.random.normal(k1, (B, Q), dtype=jnp.float32)
    target = jax.random.normal(k2, (B, Q), dtype=jnp.float32)
    loss = jax.block_until_ready(pinball_loss(pred, target, quantiles))
    ref = pinball_loss_ref(pred, target, quantiles)
    assert jnp.allclose(loss, ref, rtol=1e-5, atol=1e-4), (loss, ref)

    # 2) Forced tiny tiles: multi-tile grid + ragged last tile + partial sums.
    B2 = 300
    pred2 = jax.random.normal(k3, (B2, Q), dtype=jnp.float32)
    target2 = jax.random.normal(k4, (B2, Q), dtype=jnp.float32)
    loss2 = jax.block_until_ready(
        pinball_loss(pred2, target2, quantiles, tile_rows=8))
    ref2 = pinball_loss_ref(pred2, target2, quantiles)
    assert jnp.allclose(loss2, ref2, rtol=1e-5, atol=1e-4), (loss2, ref2)

    # 3) Medium case: exercises the strip-mined fori_loop accumulation path.
    B3 = 9000
    pred3 = jax.random.normal(k5, (B3, Q), dtype=jnp.float32)
    target3 = jax.random.normal(k6, (B3, Q), dtype=jnp.float32)
    loss3 = jax.block_until_ready(pinball_loss(pred3, target3, quantiles))
    ref3 = pinball_loss_ref(pred3, target3, quantiles)
    assert jnp.allclose(loss3, ref3, rtol=1e-5, atol=1e-4), (loss3, ref3)

    # 4) bf16 streaming (dtype-aware sublane rounding, f32 math in-kernel).
    B4 = 64
    pred4 = jax.random.normal(k7, (B4, Q), dtype=jnp.bfloat16)
    target4 = jax.random.normal(k8, (B4, Q), dtype=jnp.bfloat16)
    loss4 = jax.block_until_ready(pinball_loss(pred4, target4, quantiles))
    ref4 = pinball_loss_ref(pred4, target4, quantiles)
    assert jnp.allclose(loss4, ref4, rtol=1e-5, atol=1e-4), (loss4, ref4)

    print("KERNEL_OK")
</pallas_src>

<mosaic_0001>
module attributes {stable_mosaic.version = 11 : i64} {
  func.func @kernel(%arg0: i32, %arg1: memref<8x128xf32, #tpu.memory_space<vmem>>, %arg2: memref<8x128xf32, #tpu.memory_space<vmem>>, %arg3: memref<1x128xf32, #tpu.memory_space<vmem>>, %arg4: memref<1x1xf32, #tpu.memory_space<smem>>) attributes {dimension_semantics = [#tpu.dimension_semantics<parallel>], iteration_bounds = array<i64: 1>, scalar_prefetch = 0 : i64, scratch_operands = 0 : i64, tpu.core_type = #tpu.core_type<tc>, window_params = [{transform_indices = @transform_0, window_bounds = array<i64: 8, 128>}, {transform_indices = @transform_1, window_bounds = array<i64: 8, 128>}, {pipeline_mode = #tpu.pipeline_mode<synchronous>, transform_indices = @transform_2, window_bounds = array<i64: 1, 128>}, {transform_indices = @transform_3, window_bounds = array<i64: 1, 1>}]} {
    %c0 = arith.constant 0 : index
    %c0_0 = arith.constant 0 : index
    %0 = vector.load %arg3[%c0, %c0_0] : memref<1x128xf32, #tpu.memory_space<vmem>>, vector<1x128xf32>
    %c8_i32 = arith.constant 8 : i32
    %1 = arith.muli %arg0, %c8_i32 : i32
    %c0_1 = arith.constant 0 : index
    %c0_2 = arith.constant 0 : index
    %2 = vector.load %arg1[%c0_1, %c0_2] : memref<8x128xf32, #tpu.memory_space<vmem>>, vector<8x128xf32>
    %c0_3 = arith.constant 0 : index
    %c0_4 = arith.constant 0 : index
    %3 = vector.load %arg2[%c0_3, %c0_4] : memref<8x128xf32, #tpu.memory_space<vmem>>, vector<8x128xf32>
    %4 = arith.subf %3, %2 : vector<8x128xf32>
    %5 = vector.broadcast %0 : vector<1x128xf32> to vector<8x128xf32>
    %6 = arith.mulf %5, %4 : vector<8x128xf32>
    %cst = arith.constant 0.000000e+00 : f32
    %7 = vector.broadcast %cst : f32 to vector<8x128xf32>
    %8 = arith.subf %7, %4 : vector<8x128xf32>
    %cst_5 = arith.constant 0.000000e+00 : f32
    %9 = vector.broadcast %cst_5 : f32 to vector<8x128xf32>
    %10 = arith.maximumf %8, %9 : vector<8x128xf32>
    %11 = arith.addf %6, %10 : vector<8x128xf32>
    %12 = tpu.iota {dimensions = array<i32: 0>} : vector<8x1xi32>
    %13 = vector.broadcast %1 : i32 to vector<8x1xi32>
    %14 = arith.addi %13, %12 : vector<8x1xi32>
    %c1_i32 = arith.constant 1 : i32
    %15 = vector.broadcast %c1_i32 : i32 to vector<8x1xi32>
    %16 = arith.cmpi slt, %14, %15 : vector<8x1xi32>
    %cst_6 = arith.constant 0.000000e+00 : f32
    %17 = vector.shape_cast %16 : vector<8x1xi1> to vector<8x1xi1>
    %18 = vector.broadcast %17 : vector<8x1xi1> to vector<8x128xi1>
    %19 = vector.broadcast %cst_6 : f32 to vector<8x128xf32>
    %20 = arith.select %18, %11, %19 : vector<8x128xi1>, vector<8x128xf32>
    %21 = vector.shape_cast %20 : vector<8x128xf32> to vector<1x8x128xf32>
    %cst_7 = arith.constant dense<0.000000e+00> : vector<1xf32>
    %22 = vector.multi_reduction <add>, %21, %cst_7 [1, 2] : vector<1x8x128xf32> to vector<1xf32>
    %23 = vector.shape_cast %22 : vector<1xf32> to vector<1x1x1xf32>
    %24 = vector.extract %23[0, 0, 0] : f32 from vector<1x1x1xf32>
    %c0_8 = arith.constant 0 : index
    %c0_9 = arith.constant 0 : index
    %25 = memref.load %arg4[%c0_8, %c0_9] : memref<1x1xf32, #tpu.memory_space<smem>>
    memref.store %24, %arg4[%c0_8, %c0_9] : memref<1x1xf32, #tpu.memory_space<smem>>
    return
  }
  func.func @transform_0(%arg0: i32) -> (i32, i32) {
    %c0_i32 = arith.constant 0 : i32
    %c0_i32_0 = arith.constant 0 : i32
    return %arg0, %c0_i32 : i32, i32
  }
  func.func @transform_1(%arg0: i32) -> (i32, i32) {
    %c0_i32 = arith.constant 0 : i32
    %c0_i32_0 = arith.constant 0 : i32
    return %arg0, %c0_i32 : i32, i32
  }
  func.func @transform_2(%arg0: i32) -> (i32, i32) {
    %c0_i32 = arith.constant 0 : i32
    %c0_i32_0 = arith.constant 0 : i32
    %c0_i32_1 = arith.constant 0 : i32
    return %c0_i32, %c0_i32_0 : i32, i32
  }
  func.func @transform_3(%arg0: i32) -> (i32, i32) {
    %c0_i32 = arith.constant 0 : i32
    %c0_i32_0 = arith.constant 0 : i32
    return %arg0, %c0_i32 : i32, i32
  }
}

</mosaic_0001>

<bundles_post_ra>
// kernel: tpu_custom_call.1
= control target key start
LH: loop header
LB: loop body
LE: loop exit
PB: predicated region body
PF: predicated region fallthrough
CT: control target
= control target key end

     0   :  { %8 = vsyncpa [#allocation3], 0  ;;  %s152_s0 = inlined_call_operand.hbm [shape: f32[1,128], index: 0, kind: input, shape index: {}]   ;;  %s153_s1 = inlined_call_operand.vmem [shape: f32[1,128], index: 1, kind: input, shape index: {}]   ;;  %s154_s2 = inlined_call_operand.vmem [shape: f32[1,128], index: 2, kind: input, shape index: {}]   ;;  %s155_s3 = inlined_call_operand.hbm [shape: f32[1,1], index: 3, kind: output, shape index: {}]  }
   0x1   :  { %9 = vsyncpa [#allocation4], 0 }
   0x2   :  { %14 = vsyncadd [#allocation3], 112  ;;  %s116_s12 = smov [#allocation2]  }
   0x3   :  { %s15_s13 = sshll.u32 %s116_s12, 4  ;;  %s16_s13 = int_to_ptr.vmem [resolvable:$true] %s15_s13 }
   0x4   :  { %s92_s14 = scalar_lea.vmem %s16_s13, 16  ;;  %s96_s15 = scalar_lea.vmem %s16_s13, 128 }
   0x5   :  { %p93_p0 = scmp.ne.s32.totalorder %s16_s13, %s92_s14  ;;  %p97_p1 = scmp.lt.s32.totalorder %s16_s13, %s16_s13 }
   0x6   :  { %p98_p2 = scmp.lt.s32.totalorder %s96_s15, %s92_s14 }
   0x8   :  { %p99_p3 = por %p98_p2, %p97_p1 }
   0xa   :  { %p100_p4 = pnand %p99_p3, %p93_p0 }
   0xc   :  { %103 = shalt.err (!%p100_p4)
}
   0xd   :  { %s117_s16 = smov 16   ;;  %s118_s17 = smov 1  }
   0xe   :  { %21 = dma.hbm_to_vmem [thread:$0]  %s152_s0, 16, %s16_s13, [#allocation3], %s117_s16, %s117_s16, %s118_s17  }
   0xf   :  { %112 = dma.done.wait [#allocation3], 128  }
  0x10   :  { %113 = vsyncadd [#allocation3], 4294967168  ;;  %v44_v0 = vlaneseq  ;;  %v77_v1 = vld [vmem:[%s154_s2] ss:$0 sm:$0xff] }
  0x11   :  { %v31_v2 = vld [vmem:[#allocation2] sm:$0xff] }
  0x12   :  { %v32_v3 = vld [vmem:[%s153_s1] sm:$0xff]  ;;  %v45_v5 = vshrl.u32 %v44_v0, 7  ;;  %s119_s1 = smov [#allocation5]  }
  0x13   :  { %v33_v4 = vsub.f32 %v32_v3, %v31_v2 }
  0x14   :  { %vm48_vm0 = vcmp.lt.s32.totalorder %v45_v5, 1 }
  0x15   :  { %v40_v6 = vmul.f32 %v77_v1, %v33_v4  ;;  %v41_v7 = vsub.f32 0.0, %v33_v4 }
  0x17   :  { %v42_v8 = vmax.f32 %v41_v7, 0.0 }
  0x19   :  { %v43_v9 = vadd.f32 %v42_v8, %v40_v6 }
  0x1b   :  { %v51_v10 = vsel %vm48_vm0, %v43_v9, 0.0 }
  0x1c   :  { %52 = vadd.xlane.f32.xlu0 %v51_v10 }
  0xa5   :  { %v53_v11 = vpop.xlane.xlu0 %52 }
  0xa6   :  { %v54_v12 = vrot.slane %v53_v11, 4 }
  0xa8   :  { %v55_v13 = vadd.f32 %v54_v12, %v53_v11 }
  0xaa   :  { %v56_v14 = vrot.slane %v55_v13, 2 }
  0xac   :  { %v57_v15 = vadd.f32 %v56_v14, %v55_v13 }
  0xae   :  { %v58_v16 = vrot.slane %v57_v15, 1 }
  0xb0   :  { %v59_v17 = vadd.f32 %v58_v16, %v57_v15 }
  0xb2   :  { %78 = vpush %v59_v17 }
  0xe3   :  { %s79_s0 = spop %78 }
  0xe4   :  { %62 = sst [smem:[#allocation5]] %s79_s0 }
  0xe5   :  { %70 = dma.smem_to_hbm %s119_s1, 16, %s155_s3, [#allocation4]  }
  0xe6   :  { %114 = dma.done.wait [#allocation4], 16  }
  0xe7   :  { %115 = vsyncadd [#allocation4], 4294967280 }
  0xe8   :  { %74 = sfence }
  0xe9   :  { %75 = vsyncpa [#allocation3], 1 }
  0xea   :  { %76 = vsyncpa [#allocation4], 1 }

</bundles_post_ra>
